<compile_context>
chip_gen: v7x
topology: tpu7x:2x2x1
jax: 0.10.0
libtpu: 0.0.40
codegen_flags: <defaults>
</compile_context>

<pallas_src>
import functools

import jax
import jax.numpy as jnp
from jax.experimental import pallas as pl
from jax.experimental.pallas import tpu as pltpu

LANES = 128                       # vreg lane width
SUBLANES = 8                      # f32 vreg sublane count
MAX_TILE_BYTES_PER_BUF = 2 << 20  # 2 MiB per input per pipeline buffer
MIN_PALLAS_ELEMS = 1 << 16        # below this a fused XLA reduce wins


def _round_up(x, m):
    return (x + m - 1) // m * m


def _detect_core_splits():
    """2-way megacore split only where two TensorCores share one chip's HBM."""
    try:
        kind = jax.devices()[0].device_kind.lower()
    except Exception:
        return 1
    if "v7" in kind:
        return 2
    if "v4" in kind or "v5p" in kind:
        return 2
    return 1      # v5e / v6e / unknown: single TensorCore -> no split


def _recon_mean_kernel(target_ref, j_ref, t_ref, b_ref, o_ref, acc_ref, *,
                       n_rows, steps_per_core, full_blocks, inv_n):
    c = pl.program_id(0)   # core-split index ("parallel")
    i = pl.program_id(1)   # row-block index within this core ("arbitrary")

    @pl.when(i == 0)
    def _init():
        acc_ref[...] = jnp.zeros_like(acc_ref)

    tile_rows = target_ref.shape[0]

    # f32 math regardless of input dtype (v5e has no bf16 VPU/EUP).
    i_hat = (j_ref[...].astype(jnp.float32) * t_ref[...].astype(jnp.float32)
             + b_ref[...].astype(jnp.float32))
    diff = jnp.abs(i_hat - target_ref[...].astype(jnp.float32))

    logical_block = c * steps_per_core + i

    def fold(x):
        # (tile_rows, 128) -> (8, 128): the reshape splits the leading axis
        # only (never crosses an (8,128) tile), and the leading-axis sum is
        # pure VPU vreg adds into the resident (8,128) accumulator.
        return jnp.sum(x.reshape(tile_rows // SUBLANES, SUBLANES, LANES),
                       axis=0)

    # Steady-state blocks (fully in range): no mask work at all.
    @pl.when(logical_block < full_blocks)
    def _steady():
        acc_ref[...] += fold(diff)

    # Ragged tail block and fully-clamped trailing steps: mask rows >= n_rows.
    @pl.when(logical_block >= full_blocks)
    def _ragged():
        row_start = logical_block * tile_rows
        row_ids = row_start + jax.lax.broadcasted_iota(jnp.int32, diff.shape, 0)
        acc_ref[...] += fold(jnp.where(row_ids < n_rows, diff, 0.0))

    @pl.when(i == pl.num_programs(1) - 1)
    def _finalize():
        # One small (8x128) cross-lane reduce + scale, then a single
        # lane-dense store of this core's partial mean.
        partial = jnp.sum(acc_ref[...]) * inv_n
        o_ref[...] = jnp.full(o_ref.shape, partial, dtype=o_ref.dtype)


def reconstruction_loss(target, J, T, B, loss_weight=1.0, reduction="mean",
                        use_pallas=None, core_splits=None, max_tile_rows=None):
    """JAX/Pallas equivalent of ReconstructionLoss.forward(target, J, T, B).

    Faithful to the PyTorch reference:
      * reduction='mean' -> scalar mean(|J*T + B - target|)
      * reduction='sum'  -> the reference actually returns the *unreduced*
                            elementwise L1 map (F.l1_loss(..., 'none')).
      * loss_weight is stored but never applied in forward.
    """
    del loss_weight  # stored but unused in the reference forward
    if reduction == "sum":
        # TODO(synk): kept as fused XLA elementwise (pure map, no reduction) —
        # a Pallas kernel adds nothing for a memcpy-bound elementwise op.
        return jnp.abs(J.astype(jnp.float32) * T.astype(jnp.float32)
                       + B.astype(jnp.float32) - target.astype(jnp.float32))
    if reduction != "mean":
        raise ValueError(f"unsupported reduction: {reduction!r}")

    n = int(target.size)
    if n == 0:
        return jnp.float32(0.0)
    if use_pallas is None:
        use_pallas = (n % LANES == 0) and (n >= MIN_PALLAS_ELEMS)
    if (not use_pallas) or (n % LANES != 0):
        # Tiny or lane-unaligned inputs: fused XLA elementwise+reduce wins.
        return jnp.mean(jnp.abs(J.astype(jnp.float32) * T.astype(jnp.float32)
                                + B.astype(jnp.float32)
                                - target.astype(jnp.float32)))

    num_splits = _detect_core_splits() if core_splits is None else int(core_splits)
    num_splits = max(1, num_splits)

    itemsizes = [jnp.dtype(x.dtype).itemsize for x in (target, J, T, B)]
    # Native sublane multiple of the narrowest input dtype (8 f32 / 16 bf16).
    sublane_mult = max(SUBLANES, 32 // max(1, min(itemsizes)))
    if max_tile_rows is None:
        max_tile_rows = MAX_TILE_BYTES_PER_BUF // (LANES * max(itemsizes))
    max_tile_rows = max(sublane_mult,
                        (int(max_tile_rows) // sublane_mult) * sublane_mult)

    rows = n // LANES
    rows_per_core = pl.cdiv(rows, num_splits)
    tile_rows = min(max_tile_rows, _round_up(rows_per_core, sublane_mult))
    nblocks = pl.cdiv(rows, tile_rows)
    splits = min(num_splits, nblocks)           # never more cores than blocks
    steps_per_core = pl.cdiv(nblocks, splits)
    full_blocks = rows // tile_rows             # blocks fully inside the data

    # Free reshapes (no padding copies); keep the original dtype in HBM.
    def to_slab(x):
        return jnp.reshape(x, (rows, LANES))

    tgt2, j2, t2, b2 = (to_slab(x) for x in (target, J, T, B))

    def in_map(c, i):
        # Contiguous per-core block range. A clamped trailing step on the last
        # core repeats that core's previous block index, so the pipeline does
        # NOT re-issue the DMA; its contribution is fully masked in-kernel.
        return (jnp.minimum(c * steps_per_core + i, nblocks - 1), 0)

    in_spec = pl.BlockSpec((tile_rows, LANES), in_map)
    out_spec = pl.BlockSpec((SUBLANES, LANES), lambda c, i: (c, 0))

    kernel = functools.partial(
        _recon_mean_kernel,
        n_rows=rows,
        steps_per_core=steps_per_core,
        full_blocks=full_blocks,
        inv_n=1.0 / float(n),
    )

    out = pl.pallas_call(
        kernel,
        out_shape=jax.ShapeDtypeStruct((splits * SUBLANES, LANES), jnp.float32),
        grid_spec=pltpu.PrefetchScalarGridSpec(
            num_scalar_prefetch=0,
            grid=(splits, steps_per_core),
            in_specs=[in_spec, in_spec, in_spec, in_spec],
            out_specs=out_spec,
            scratch_shapes=[pltpu.VMEM((SUBLANES, LANES), jnp.float32)],
        ),
        compiler_params=pltpu.CompilerParams(
            dimension_semantics=("parallel", "arbitrary"),
            # ~16 MiB double-buffered footprint; 32 MiB limit is safe on
            # v7x's 64 MiB physical VMEM and v5e/v6e's 128 MiB.
            vmem_limit_bytes=32 * 1024 * 1024,
        ),
    )(tgt2, j2, t2, b2)

    # Each core's (8,128) block is a broadcast of its partial mean; sum the
    # per-core partials (works for any split count).
    return jnp.sum(out[::SUBLANES, 0])


def _make_inputs(key, shape, dtype):
    k1, k2, k3, k4 = jax.random.split(key, 4)
    target = jax.random.normal(k1, shape, jnp.float32).astype(dtype)
    J = jax.random.normal(k2, shape, jnp.float32).astype(dtype)
    T = jax.random.uniform(k3, shape, jnp.float32).astype(dtype)
    B = (jax.random.normal(k4, shape, jnp.float32) * 0.1).astype(dtype)
    return target, J, T, B


if __name__ == "__main__":
    key = jax.random.PRNGKey(0)
    # (shape, dtype, forced core_splits, forced max_tile_rows)
    cases = [
        ((2, 4, 16, 16), jnp.float32, None, None),    # NCHW module-scale case
        ((2, 3, 17, 128), jnp.float32, None, None),   # ragged row count (masked tail)
        ((2, 8, 96, 128), jnp.float32, 2, None),      # forced 2-way split, exact
        ((2, 8, 144, 256), jnp.float32, 2, 2048),     # 2-way split + ragged + clamped step
        ((2, 4, 16, 16), jnp.bfloat16, None, None),   # bf16 passthrough, (16,128) tile
    ]
    for idx, (shape, dtype, splits, mtr) in enumerate(cases):
        tgt, J, T, B = _make_inputs(jax.random.fold_in(key, idx), shape, dtype)
        loss = reconstruction_loss(tgt, J, T, B, use_pallas=True,
                                   core_splits=splits, max_tile_rows=mtr)
        loss = jax.block_until_ready(loss)
        ref = jnp.mean(jnp.abs(J.astype(jnp.float32) * T.astype(jnp.float32)
                               + B.astype(jnp.float32)
                               - tgt.astype(jnp.float32)))
        assert jnp.allclose(loss, ref, rtol=1e-4, atol=1e-5), (
            shape, str(dtype), float(loss), float(ref))

    # Auto-mode fallback (tiny input -> fused XLA reduce) sanity check.
    tgt, J, T, B = _make_inputs(jax.random.fold_in(key, 99), (2, 4, 16, 16),
                                jnp.float32)
    loss = jax.block_until_ready(reconstruction_loss(tgt, J, T, B))
    ref = jnp.mean(jnp.abs(J * T + B - tgt))
    assert jnp.allclose(loss, ref, rtol=1e-5, atol=1e-6)

    # reduction='sum' reference quirk: returns the unreduced L1 map.
    m = jax.block_until_ready(
        reconstruction_loss(tgt, J, T, B, reduction="sum"))
    assert m.shape == tgt.shape
    assert jnp.allclose(m, jnp.abs(J * T + B - tgt), rtol=1e-5, atol=1e-6)

    print("KERNEL_OK")
</pallas_src>

<mosaic_0001>
module attributes {stable_mosaic.version = 11 : i64} {
  func.func @_recon_mean_kernel(%arg0: i32, %arg1: i32, %arg2: memref<16x128xf32, #tpu.memory_space<vmem>>, %arg3: memref<16x128xf32, #tpu.memory_space<vmem>>, %arg4: memref<16x128xf32, #tpu.memory_space<vmem>>, %arg5: memref<16x128xf32, #tpu.memory_space<vmem>>, %arg6: memref<8x128xf32, #tpu.memory_space<vmem>>, %arg7: memref<8x128xf32, #tpu.memory_space<vmem>>) attributes {dimension_semantics = [#tpu.dimension_semantics<parallel>, #tpu.dimension_semantics<arbitrary>], iteration_bounds = array<i64: 1, 1>, scalar_prefetch = 0 : i64, scratch_operands = 1 : i64, tpu.core_type = #tpu.core_type<tc>, window_params = [{transform_indices = @transform_0, window_bounds = array<i64: 16, 128>}, {transform_indices = @transform_1, window_bounds = array<i64: 16, 128>}, {transform_indices = @transform_2, window_bounds = array<i64: 16, 128>}, {transform_indices = @transform_3, window_bounds = array<i64: 16, 128>}, {transform_indices = @transform_4, window_bounds = array<i64: 8, 128>}]} {
    %c0_i32 = arith.constant 0 : i32
    %0 = arith.cmpi eq, %arg1, %c0_i32 : i32
    %1 = arith.extui %0 : i1 to i32
    %c0_i32_0 = arith.constant 0 : i32
    %2 = arith.cmpi ne, %1, %c0_i32_0 : i32
    scf.if %2 {
      %cst = arith.constant 0.000000e+00 : f32
      %22 = vector.broadcast %cst : f32 to vector<8x128xf32>
      %c0_14 = arith.constant 0 : index
      %c0_15 = arith.constant 0 : index
      %23 = vector.load %arg7[%c0_14, %c0_15] : memref<8x128xf32, #tpu.memory_space<vmem>>, vector<8x128xf32>
      tpu.vector_store %arg7[%c0_14, %c0_15], %22 {strides = array<i32>} : memref<8x128xf32, #tpu.memory_space<vmem>>, vector<8x128xf32>,
    } else {
    }
    %c0 = arith.constant 0 : index
    %c0_1 = arith.constant 0 : index
    %3 = vector.load %arg3[%c0, %c0_1] : memref<16x128xf32, #tpu.memory_space<vmem>>, vector<16x128xf32>
    %c0_2 = arith.constant 0 : index
    %c0_3 = arith.constant 0 : index
    %4 = vector.load %arg4[%c0_2, %c0_3] : memref<16x128xf32, #tpu.memory_space<vmem>>, vector<16x128xf32>
    %5 = arith.mulf %3, %4 : vector<16x128xf32>
    %c0_4 = arith.constant 0 : index
    %c0_5 = arith.constant 0 : index
    %6 = vector.load %arg5[%c0_4, %c0_5] : memref<16x128xf32, #tpu.memory_space<vmem>>, vector<16x128xf32>
    %7 = arith.addf %5, %6 : vector<16x128xf32>
    %c0_6 = arith.constant 0 : index
    %c0_7 = arith.constant 0 : index
    %8 = vector.load %arg2[%c0_6, %c0_7] : memref<16x128xf32, #tpu.memory_space<vmem>>, vector<16x128xf32>
    %9 = arith.subf %7, %8 : vector<16x128xf32>
    %10 = math.absf %9 : vector<16x128xf32>
    %c1_i32 = arith.constant 1 : i32
    %11 = arith.muli %arg0, %c1_i32 : i32
    %12 = arith.addi %11, %arg1 : i32
    %c1_i32_8 = arith.constant 1 : i32
    %13 = arith.cmpi slt, %12, %c1_i32_8 : i32
    %14 = arith.extui %13 : i1 to i32
    %c0_i32_9 = arith.constant 0 : i32
    %15 = arith.cmpi ne, %14, %c0_i32_9 : i32
    scf.if %15 {
      %c0_14 = arith.constant 0 : index
      %c0_15 = arith.constant 0 : index
      %22 = vector.load %arg7[%c0_14, %c0_15] : memref<8x128xf32, #tpu.memory_space<vmem>>, vector<8x128xf32>
      %23 = vector.shape_cast %10 : vector<16x128xf32> to vector<2x8x128xf32>
      %cst = arith.constant dense<0.000000e+00> : vector<8x128xf32>
      %24 = vector.multi_reduction <add>, %23, %cst [0] : vector<2x8x128xf32> to vector<8x128xf32>
      %25 = arith.addf %22, %24 : vector<8x128xf32>
      %c0_16 = arith.constant 0 : index
      %c0_17 = arith.constant 0 : index
      %26 = vector.load %arg7[%c0_16, %c0_17] : memref<8x128xf32, #tpu.memory_space<vmem>>, vector<8x128xf32>
      tpu.vector_store %arg7[%c0_16, %c0_17], %25 {strides = array<i32>} : memref<8x128xf32, #tpu.memory_space<vmem>>, vector<8x128xf32>,
    } else {
    }
    %c1_i32_10 = arith.constant 1 : i32
    %16 = arith.cmpi sge, %12, %c1_i32_10 : i32
    %17 = arith.extui %16 : i1 to i32
    %c0_i32_11 = arith.constant 0 : i32
    %18 = arith.cmpi ne, %17, %c0_i32_11 : i32
    scf.if %18 {
      %c16_i32 = arith.constant 16 : i32
      %22 = arith.muli %12, %c16_i32 : i32
      %23 = tpu.iota {dimensions = array<i32: 0>} : vector<16x128xi32>
      %24 = vector.broadcast %22 : i32 to vector<16x128xi32>
      %25 = arith.addi %24, %23 : vector<16x128xi32>
      %c0_14 = arith.constant 0 : index
      %c0_15 = arith.constant 0 : index
      %26 = vector.load %arg7[%c0_14, %c0_15] : memref<8x128xf32, #tpu.memory_space<vmem>>, vector<8x128xf32>
      %c16_i32_16 = arith.constant 16 : i32
      %27 = vector.broadcast %c16_i32_16 : i32 to vector<16x128xi32>
      %28 = arith.cmpi slt, %25, %27 : vector<16x128xi32>
      %cst = arith.constant 0.000000e+00 : f32
      %29 = vector.broadcast %cst : f32 to vector<16x128xf32>
      %30 = arith.select %28, %10, %29 : vector<16x128xi1>, vector<16x128xf32>
      %31 = vector.shape_cast %30 : vector<16x128xf32> to vector<2x8x128xf32>
      %cst_17 = arith.constant dense<0.000000e+00> : vector<8x128xf32>
      %32 = vector.multi_reduction <add>, %31, %cst_17 [0] : vector<2x8x128xf32> to vector<8x128xf32>
      %33 = arith.addf %26, %32 : vector<8x128xf32>
      %c0_18 = arith.constant 0 : index
      %c0_19 = arith.constant 0 : index
      %34 = vector.load %arg7[%c0_18, %c0_19] : memref<8x128xf32, #tpu.memory_space<vmem>>, vector<8x128xf32>
      tpu.vector_store %arg7[%c0_18, %c0_19], %33 {strides = array<i32>} : memref<8x128xf32, #tpu.memory_space<vmem>>, vector<8x128xf32>,
    } else {
    }
    %c0_i32_12 = arith.constant 0 : i32
    %19 = arith.cmpi eq, %arg1, %c0_i32_12 : i32
    %20 = arith.extui %19 : i1 to i32
    %c0_i32_13 = arith.constant 0 : i32
    %21 = arith.cmpi ne, %20, %c0_i32_13 : i32
    scf.if %21 {
      %c0_14 = arith.constant 0 : index
      %c0_15 = arith.constant 0 : index
      %22 = vector.load %arg7[%c0_14, %c0_15] : memref<8x128xf32, #tpu.memory_space<vmem>>, vector<8x128xf32>
      %23 = vector.shape_cast %22 : vector<8x128xf32> to vector<1x8x128xf32>
      %cst = arith.constant dense<0.000000e+00> : vector<1xf32>
      %24 = vector.multi_reduction <add>, %23, %cst [1, 2] : vector<1x8x128xf32> to vector<1xf32>
      %25 = vector.shape_cast %24 : vector<1xf32> to vector<1x1x1xf32>
      %26 = vector.extract %25[0, 0, 0] : f32 from vector<1x1x1xf32>
      %cst_16 = arith.constant 4.8828125E-4 : f32
      %27 = arith.mulf %26, %cst_16 : f32
      %28 = vector.broadcast %27 : f32 to vector<8x128xf32>
      %c0_17 = arith.constant 0 : index
      %c0_18 = arith.constant 0 : index
      %29 = vector.load %arg6[%c0_17, %c0_18] : memref<8x128xf32, #tpu.memory_space<vmem>>, vector<8x128xf32>
      tpu.vector_store %arg6[%c0_17, %c0_18], %28 {strides = array<i32>} : memref<8x128xf32, #tpu.memory_space<vmem>>, vector<8x128xf32>,
    } else {
    }
    return
  }
  func.func @transform_0(%arg0: i32, %arg1: i32) -> (i32, i32) {
    %c1_i32 = arith.constant 1 : i32
    %0 = arith.muli %arg0, %c1_i32 : i32
    %1 = arith.addi %0, %arg1 : i32
    %c0_i32 = arith.constant 0 : i32
    %2 = arith.minsi %1, %c0_i32 : i32
    %c0_i32_0 = arith.constant 0 : i32
    %c0_i32_1 = arith.constant 0 : i32
    return %2, %c0_i32_0 : i32, i32
  }
  func.func @transform_1(%arg0: i32, %arg1: i32) -> (i32, i32) {
    %c1_i32 = arith.constant 1 : i32
    %0 = arith.muli %arg0, %c1_i32 : i32
    %1 = arith.addi %0, %arg1 : i32
    %c0_i32 = arith.constant 0 : i32
    %2 = arith.minsi %1, %c0_i32 : i32
    %c0_i32_0 = arith.constant 0 : i32
    %c0_i32_1 = arith.constant 0 : i32
    return %2, %c0_i32_0 : i32, i32
  }
  func.func @transform_2(%arg0: i32, %arg1: i32) -> (i32, i32) {
    %c1_i32 = arith.constant 1 : i32
    %0 = arith.muli %arg0, %c1_i32 : i32
    %1 = arith.addi %0, %arg1 : i32
    %c0_i32 = arith.constant 0 : i32
    %2 = arith.minsi %1, %c0_i32 : i32
    %c0_i32_0 = arith.constant 0 : i32
    %c0_i32_1 = arith.constant 0 : i32
    return %2, %c0_i32_0 : i32, i32
  }
  func.func @transform_3(%arg0: i32, %arg1: i32) -> (i32, i32) {
    %c1_i32 = arith.constant 1 : i32
    %0 = arith.muli %arg0, %c1_i32 : i32
    %1 = arith.addi %0, %arg1 : i32
    %c0_i32 = arith.constant 0 : i32
    %2 = arith.minsi %1, %c0_i32 : i32
    %c0_i32_0 = arith.constant 0 : i32
    %c0_i32_1 = arith.constant 0 : i32
    return %2, %c0_i32_0 : i32, i32
  }
  func.func @transform_4(%arg0: i32, %arg1: i32) -> (i32, i32) {
    %c0_i32 = arith.constant 0 : i32
    %c0_i32_0 = arith.constant 0 : i32
    return %arg0, %c0_i32 : i32, i32
  }
}

</mosaic_0001>

<bundles_post_ra>
// kernel: tpu_custom_call.1
= control target key start
LH: loop header
LB: loop body
LE: loop exit
PB: predicated region body
PF: predicated region fallthrough
CT: control target
= control target key end

     0   :  { %9 = vsyncpa [#allocation4], 0  ;;  %s448_s0 = inlined_call_operand.hbm [shape: f32[16,128], index: 0, kind: input, shape index: {}]   ;;  %s449_s1 = inlined_call_operand.hbm [shape: f32[16,128], index: 1, kind: input, shape index: {}]   ;;  %s450_s2 = inlined_call_operand.hbm [shape: f32[16,128], index: 2, kind: input, shape index: {}]   ;;  %s451_s3 = inlined_call_operand.hbm [shape: f32[16,128], index: 3, kind: input, shape index: {}]   ;;  %s452_s4 = inlined_call_operand.hbm [shape: f32[8,128], index: 4, kind: output, shape index: {}]  }
   0x1   :  { %10 = vsyncpa [#allocation7], 0 }
   0x2   :  { %11 = vsyncpa [#allocation10], 0 }
   0x3   :  { %12 = vsyncpa [#allocation5], 0  ;;  %s330_s15 = smov [#allocation6]   ;;  %s331_s17 = smov [#allocation3]  }
   0x4   :  { %s42_s16 = sshll.u32 %s330_s15, 4  ;;  %s24_s18 = sshll.u32 %s331_s17, 4  ;;  %s43_s16 = int_to_ptr.vmem [resolvable:$true] %s42_s16  ;;  %s362_s18 = int_to_ptr.vmem [resolvable:$true] %s24_s18 }
   0x5   :  { %s212_s21 = scalar_lea.hbm %s449_s1, 256 }
   0x6   :  { %p213_p0 = scmp.ne.s32.totalorder %s449_s1, %s212_s21  ;;  %p216_p1 = scmp.lt.u32.totalorder %s212_s21, %s449_s1 }
   0x8   :  { %p218_p2 = pnand %p216_p1, %p213_p0 }
   0xa   :  { %221 = shalt.err (!%p218_p2)
}
   0xb   :  { %s222_s26 = scalar_lea.vmem %s43_s16, 256  ;;  %p227_p4 = scmp.lt.s32.totalorder %s43_s16, %s43_s16 }
   0xc   :  { %p223_p3 = scmp.ne.s32.totalorder %s43_s16, %s222_s26  ;;  %p228_p5 = scmp.lt.s32.totalorder %s222_s26, %s222_s26 }
   0xe   :  { %p229_p6 = por %p228_p5, %p227_p4 }
  0x10   :  { %p230_p7 = pnand %p229_p6, %p223_p3 }
  0x12   :  { %233 = shalt.err (!%p230_p7)
}
  0x13   :  { %s332_s27 = smov 128   ;;  %s333_s28 = smov 8  }
  0x14   :  { %48 = dma.hbm_to_vmem [thread:$0]  %s449_s1, 256, %s43_s16, [#allocation7], %s332_s27, %s332_s27, %s333_s28  }
  0x15   :  { %s234_s7 = scalar_lea.hbm %s448_s0, 256 }
  0x16   :  { %p235_p8 = scmp.ne.s32.totalorder %s448_s0, %s234_s7  ;;  %p238_p9 = scmp.lt.u32.totalorder %s234_s7, %s448_s0 }
  0x18   :  { %p240_p10 = pnand %p238_p9, %p235_p8 }
  0x1a   :  { %243 = shalt.err (!%p240_p10)
}
  0x1b   :  { %s244_s12 = scalar_lea.vmem %s362_s18, 256  ;;  %p249_p12 = scmp.lt.s32.totalorder %s362_s18, %s362_s18 }
  0x1c   :  { %p245_p11 = scmp.ne.s32.totalorder %s362_s18, %s244_s12  ;;  %p250_p13 = scmp.lt.s32.totalorder %s244_s12, %s244_s12 }
  0x1e   :  { %p251_p0 = por %p250_p13, %p249_p12 }
  0x20   :  { %p252_p1 = pnand %p251_p0, %p245_p11 }
  0x22   :  { %255 = shalt.err (!%p252_p1)
}
  0x23   :  { %30 = dma.hbm_to_vmem [thread:$0]  %s448_s0, 256, %s362_s18, [#allocation4], %s332_s27, %s332_s27, %s333_s28  }
  0x24   :  { %s334_s14 = smov [#allocation8]   ;;  %s335_s16 = smov [#allocation9]  }
  0x25   :  { %s60_s15 = sshll.u32 %s334_s14, 4  ;;  %s78_s17 = sshll.u32 %s335_s16, 4  ;;  %s61_s15 = int_to_ptr.vmem [resolvable:$true] %s60_s15  ;;  %s399_s17 = int_to_ptr.vmem [resolvable:$true] %s78_s17 }
  0x26   :  { %s256_s21 = scalar_lea.hbm %s450_s2, 256 }
  0x27   :  { %p257_p2 = scmp.ne.s32.totalorder %s450_s2, %s256_s21  ;;  %p260_p3 = scmp.lt.u32.totalorder %s256_s21, %s450_s2 }
  0x29   :  { %p262_p4 = pnand %p260_p3, %p257_p2 }
  0x2b   :  { %265 = shalt.err (!%p262_p4)
}
  0x2c   :  { %s266_s0 = scalar_lea.vmem %s61_s15, 256  ;;  %p271_p6 = scmp.lt.s32.totalorder %s61_s15, %s61_s15 }
  0x2d   :  { %p267_p5 = scmp.ne.s32.totalorder %s61_s15, %s266_s0  ;;  %p272_p7 = scmp.lt.s32.totalorder %s266_s0, %s266_s0 }
  0x2f   :  { %p273_p8 = por %p272_p7, %p271_p6 }
  0x31   :  { %p274_p9 = pnand %p273_p8, %p267_p5 }
  0x33   :  { %277 = shalt.err (!%p274_p9)
}
  0x34   :  { %66 = dma.hbm_to_vmem [thread:$0]  %s450_s2, 256, %s61_s15, [#allocation7], %s332_s27, %s332_s27, %s333_s28  }
  0x35   :  { %s278_s5 = scalar_lea.hbm %s451_s3, 256 }
  0x36   :  { %p279_p10 = scmp.ne.s32.totalorder %s451_s3, %s278_s5  ;;  %p282_p11 = scmp.lt.u32.totalorder %s278_s5, %s451_s3 }
  0x38   :  { %p284_p12 = pnand %p282_p11, %p279_p10 }
  0x3a   :  { %287 = shalt.err (!%p284_p12)
}
  0x3b   :  { %s288_s10 = scalar_lea.vmem %s399_s17, 256  ;;  %p293_p0 = scmp.lt.s32.totalorder %s399_s17, %s399_s17 }
  0x3c   :  { %p289_p13 = scmp.ne.s32.totalorder %s399_s17, %s288_s10  ;;  %p294_p1 = scmp.lt.s32.totalorder %s288_s10, %s288_s10 }
  0x3e   :  { %p295_p2 = por %p294_p1, %p293_p0 }
  0x40   :  { %p296_p3 = pnand %p295_p2, %p289_p13 }
  0x42   :  { %299 = shalt.err (!%p296_p3)
}
  0x43   :  { %84 = dma.hbm_to_vmem [thread:$0]  %s451_s3, 256, %s399_s17, [#allocation10], %s332_s27, %s332_s27, %s333_s28  }
  0x44   :  { %322 = dma.done.wait [#allocation4], 256  }
  0x45   :  { %323 = vsyncadd [#allocation4], 4294967040 }
  0x46   :  { %324 = dma.done.wait [#allocation7], 512  }
  0x47   :  { %325 = vsyncadd [#allocation7], 4294966784 }
  0x48   :  { %326 = dma.done.wait [#allocation10], 256  }
  0x49   :  { %327 = vsyncadd [#allocation10], 4294967040  ;;  %v118_v0 = vld [vmem:[#allocation6] sm:$0xff]  ;;  %v119_v1 = vld [vmem:[#allocation6 + $0x8] sm:$0xff]  ;;  %s336_s3 = smov [#allocation11]  }
  0x4a   :  { %v120_v2 = vld [vmem:[#allocation8] sm:$0xff]  ;;  %v121_v3 = vld [vmem:[#allocation8 + $0x8] sm:$0xff]  ;;  %v124_v5 = vld [vmem:[#allocation9] sm:$0xff]  ;;  %s184_s27 = sshll.u32 %s336_s3, 4  ;;  %s185_s27 = int_to_ptr.vmem [resolvable:$true] %s184_s27 }
  0x4b   :  { %v122_v4 = vmul.f32 %v120_v2, %v118_v0  ;;  %v125_v6 = vld [vmem:[#allocation9 + $0x8] sm:$0xff]  ;;  %v123_v7 = vmul.f32 %v121_v3, %v119_v1  ;;  %v128_v8 = vld [vmem:[#allocation3] sm:$0xff]  ;;  %v129_v10 = vld [vmem:[#allocation3 + $0x8] sm:$0xff]  ;;  %s300_s1 = scalar_lea.vmem %s185_s27, 128  ;;  %p305_p5 = scmp.lt.s32.totalorder %s185_s27, %s185_s27 }
  0x4c   :  { %p301_p4 = scmp.ne.s32.totalorder %s185_s27, %s300_s1  ;;  %p306_p6 = scmp.lt.s32.totalorder %s300_s1, %s300_s1 }
  0x4d   :  { %v126_v9 = vadd.f32 %v124_v5, %v122_v4  ;;  %v127_v11 = vadd.f32 %v125_v6, %v123_v7 }
  0x4e   :  { %p307_p7 = por %p306_p6, %p305_p5 }
  0x4f   :  { %v130_v12 = vsub.f32 %v126_v9, %v128_v8  ;;  %v131_v13 = vsub.f32 %v127_v11, %v129_v10 }
  0x50   :  { %p308_p8 = pnand %p307_p7, %p301_p4 }
  0x51   :  { %v132_v14 = vand.u32 2147483647, %v130_v12  ;;  %v133_v15 = vand.u32 2147483647, %v131_v13 }
  0x53   :  { %v140_v16 = vadd.f32 %v133_v15, %v132_v14 }
  0x55   :  { %166 = vadd.xlane.f32.xlu0 %v140_v16 }
  0xe2   :  { %v167_v17 = vpop.xlane.xlu0 %166 }
  0xe3   :  { %v168_v18 = vrot.slane %v167_v17, 4 }
  0xe5   :  { %v169_v19 = vadd.f32 %v168_v18, %v167_v17 }
  0xe7   :  { %v170_v20 = vrot.slane %v169_v19, 2 }
  0xe9   :  { %v171_v21 = vadd.f32 %v170_v20, %v169_v19 }
  0xeb   :  { %v172_v22 = vrot.slane %v171_v21, 1 }
  0xed   :  { %v173_v23 = vadd.f32 %v172_v22, %v171_v21 }
  0xef   :  { %203 = vpush %v173_v23 }
 0x120   :  { %s204_s28 = spop %203 }
 0x121   :  { %s175_s12 = smul.f32 0.00048828125, %s204_s28 }
 0x123   :  { %v176_v24 = vstv %s175_s12 }
 0x124   :  { %177 = vst [vmem:[#allocation11] sm:$0xff] %v176_v24 }
 0x125   :  { %311 = shalt.err (!%p308_p8)
}
 0x126   :  { %s312_s15 = scalar_lea.hbm %s452_s4, 128 }
 0x127   :  { %p313_p9 = scmp.ne.s32.totalorder %s452_s4, %s312_s15  ;;  %p316_p10 = scmp.lt.u32.totalorder %s312_s15, %s452_s4 }
 0x129   :  { %p318_p11 = pnand %p316_p10, %p313_p9 }
 0x12b   :  { %321 = shalt.err (!%p318_p11)
}
 0x12c   :  { %187 = dma.vmem_to_hbm [thread:$0]  %s185_s27, 128, %s452_s4, [#allocation5]  }
 0x12d   :  { %328 = dma.done.wait [#allocation5], 128  }
 0x12e   :  { %329 = vsyncadd [#allocation5], 4294967168 }
 0x12f   :  { %191 = vsyncpa [#allocation4], 1 }
 0x130   :  { %192 = vsyncpa [#allocation7], 1 }
 0x131   :  { %193 = vsyncpa [#allocation10], 1 }
 0x132   :  { %194 = vsyncpa [#allocation5], 1 }

</bundles_post_ra>
